<compile_context>
chip_gen: v7x
topology: tpu7x:2x2x1
jax: 0.10.0
libtpu: 0.0.40
codegen_flags: <defaults>
</compile_context>

<pallas_src>
import jax
import jax.numpy as jnp
from jax.experimental import pallas as pl
from jax.experimental.pallas import tpu as pltpu
from typing import List, Tuple


def _make_split_kernel(segments: List[int]):
    s0, s1, s2 = segments

    def split_kernel(x_ref, t_ref, a_ref, c_ref):
        # x_ref: (TM, d_obs) tile.  Slice the ref directly so Mosaic emits
        # targeted vld->vst pairs per segment.
        t_ref[...] = x_ref[:, 0:s0]
        a_ref[...] = x_ref[:, s0:s0 + s1]
        c_ref[...] = x_ref[:, s0 + s1:s0 + s1 + s2]

    return split_kernel


def _pad_to_lanes(n: int) -> int:
    """Round a last-dim size up to a full 128-lane multiple (VMEM layout)."""
    return ((n + 127) // 128) * 128


def _sublane_multiple(itemsize: int) -> int:
    """Packed-sublane row multiple: 8 for f32, 16 for bf16, 32 for int8/fp8."""
    return max(8, 32 // max(1, itemsize))


def _padded_tile_bytes(tm: int, d_obs: int, segments: List[int],
                       itemsize: int, out_buffers: int) -> int:
    """Real (lane-padded) VMEM footprint of one pipelined tile set."""
    in_bytes = 2 * tm * _pad_to_lanes(d_obs) * itemsize            # double-buffered input
    out_bytes = out_buffers * tm * sum(_pad_to_lanes(s) for s in segments) * itemsize
    return in_bytes + out_bytes


def _choose_block_rows(rows: int, d_obs: int, segments: List[int],
                       itemsize: int) -> int:
    sub = _sublane_multiple(itemsize)
    # Budget the *lane-padded* footprint (input x2 buffers + outputs x3
    # buffers).  12 MiB fits v5e's 16 MiB scoped default with headroom and is
    # comfortably below v6e/v7x's 32 MiB scoped default.
    vmem_budget = 12 * 1024 * 1024
    per_row = _padded_tile_bytes(1, d_obs, segments, itemsize, out_buffers=3)
    tm = max(sub, vmem_budget // max(1, per_row))
    tm = min(tm, 4096)
    # Megacore (v7x): split large problems into >=4 (or >=2) grid blocks so
    # the "parallel" grid axis gives both TensorCores work.  Keep blocks
    # >=512 rows so per-grid-step overhead / tiny DMAs never dominate.
    if rows >= 4 * 512:
        tm = min(tm, pl.cdiv(rows, 4))
    elif rows >= 2 * 512:
        tm = min(tm, pl.cdiv(rows, 2))
    tm = max(sub, (tm // sub) * sub)
    if rows <= tm:
        # Single block covering the whole rows axis; "block == full dim"
        # satisfies the (8,128) rule even when rows is not a sublane multiple.
        return rows
    return tm


def _out_block_spec(tm: int, s: int, multi_block: bool) -> pl.BlockSpec:
    # Triple-buffer outputs on multi-block grids (hides the writeback DMA
    # tail; there is no compute to hide it behind).  Fall back gracefully if
    # this jax build lacks pipeline_mode / Buffered.
    if multi_block and hasattr(pl, "Buffered"):
        try:
            return pl.BlockSpec((tm, s), lambda i: (i, 0),
                                pipeline_mode=pl.Buffered(3))
        except TypeError:
            pass
    return pl.BlockSpec((tm, s), lambda i: (i, 0))


def input_split(
    obs_history_flat: jax.Array,
    num_obs_in_history: int,
    d_obs: int,
    d_obs_logical_segments: List[int],
) -> Tuple[jax.Array, jax.Array, jax.Array]:
    assert len(d_obs_logical_segments) == 3, (
        "InputSplit produces exactly 3 logical segments"
    )
    assert sum(d_obs_logical_segments) == d_obs, (
        "The sum of each element of d_obs_logical_segments must be equal to d_obs"
    )
    batch_size, time, d_flat = obs_history_flat.shape
    # torch .view precondition — fail loudly instead of reinterpreting data.
    assert time * d_flat == num_obs_in_history * d_obs, (
        "time * d_flat must equal num_obs_in_history * d_obs for the view to be valid"
    )

    s0, s1, s2 = d_obs_logical_segments
    dtype = obs_history_flat.dtype
    itemsize = jnp.dtype(dtype).itemsize
    N = num_obs_in_history
    rows = batch_size * N

    # Glue: collapse to (batch*N, d_obs).  Row-major contiguous, so this is a
    # pure metadata reshape (no copy), identical to the torch .view.
    x2d = obs_history_flat.reshape(rows, d_obs)

    tm = _choose_block_rows(rows, d_obs, d_obs_logical_segments, itemsize)
    num_blocks = pl.cdiv(rows, tm)
    multi_block = num_blocks >= 3
    out_buffers = 3 if multi_block else 2

    # Corrected (lane-padded) footprint; request it explicitly with 2x
    # headroom (floor 16 MiB = v5e scoped default, cap 32 MiB = v7x scoped).
    est_bytes = _padded_tile_bytes(tm, d_obs, d_obs_logical_segments,
                                   itemsize, out_buffers)
    vmem_limit = int(min(32 * 1024 * 1024,
                         max(16 * 1024 * 1024, 2 * est_bytes)))

    kernel = _make_split_kernel(d_obs_logical_segments)

    out_shapes = (
        jax.ShapeDtypeStruct((rows, s0), dtype),
        jax.ShapeDtypeStruct((rows, s1), dtype),
        jax.ShapeDtypeStruct((rows, s2), dtype),
    )

    grid_spec = pltpu.PrefetchScalarGridSpec(
        num_scalar_prefetch=0,
        grid=(num_blocks,),
        in_specs=[pl.BlockSpec((tm, d_obs), lambda i: (i, 0))],
        out_specs=[
            _out_block_spec(tm, s0, multi_block),
            _out_block_spec(tm, s1, multi_block),
            _out_block_spec(tm, s2, multi_block),
        ],
    )

    t2d, a2d, c2d = pl.pallas_call(
        kernel,
        out_shape=out_shapes,
        grid_spec=grid_spec,
        compiler_params=pltpu.CompilerParams(
            dimension_semantics=("parallel",),
            vmem_limit_bytes=vmem_limit,
        ),
    )(x2d)

    # Glue: back to the torch output shapes (batch, N, s_i); contiguous, no copy.
    return (
        t2d.reshape(batch_size, N, s0),
        a2d.reshape(batch_size, N, s1),
        c2d.reshape(batch_size, N, s2),
    )


if __name__ == "__main__":
    def _run_case(batch, time, num_obs, d_obs, segments):
        assert (num_obs * d_obs) % time == 0
        d_flat = (num_obs * d_obs) // time
        key = jax.random.PRNGKey(0)
        x = jax.random.normal(key, (batch, time, d_flat), dtype=jnp.float32)

        t, a, c = input_split(x, num_obs, d_obs, segments)
        jax.block_until_ready((t, a, c))

        # Pure-JAX reference (matches the torch module's forward).
        ref = x.reshape(batch, num_obs, d_obs)
        s0, s1, s2 = segments
        assert t.shape == (batch, num_obs, s0)
        assert a.shape == (batch, num_obs, s1)
        assert c.shape == (batch, num_obs, s2)
        assert jnp.array_equal(t, ref[:, :, :s0])
        assert jnp.array_equal(a, ref[:, :, s0:s0 + s1])
        assert jnp.array_equal(c, ref[:, :, s0 + s1:])

    # Small single-block case (toy sizes consistent with the module forward).
    _run_case(batch=2, time=1, num_obs=8, d_obs=32, segments=[4, 8, 20])
    # Larger multi-block case: exercises the "parallel" grid split (v7x
    # megacore path), the masked ragged tail block and Buffered(3) outputs.
    _run_case(batch=4, time=2, num_obs=700, d_obs=32, segments=[4, 8, 20])

    print("KERNEL_OK")
</pallas_src>

<mosaic_0001>
module attributes {stable_mosaic.version = 11 : i64} {
  func.func @split_kernel(%arg0: i32, %arg1: memref<16x32xf32, #tpu.memory_space<vmem>>, %arg2: memref<16x4xf32, #tpu.memory_space<vmem>>, %arg3: memref<16x8xf32, #tpu.memory_space<vmem>>, %arg4: memref<16x20xf32, #tpu.memory_space<vmem>>) attributes {dimension_semantics = [#tpu.dimension_semantics<parallel>], iteration_bounds = array<i64: 1>, scalar_prefetch = 0 : i64, scratch_operands = 0 : i64, tpu.core_type = #tpu.core_type<tc>, window_params = [{transform_indices = @transform_0, window_bounds = array<i64: 16, 32>}, {transform_indices = @transform_1, window_bounds = array<i64: 16, 4>}, {transform_indices = @transform_2, window_bounds = array<i64: 16, 8>}, {transform_indices = @transform_3, window_bounds = array<i64: 16, 20>}]} {
    %c0 = arith.constant 0 : index
    %c0_0 = arith.constant 0 : index
    %0 = vector.load %arg1[%c0, %c0_0] : memref<16x32xf32, #tpu.memory_space<vmem>>, vector<16x4xf32>
    %c0_1 = arith.constant 0 : index
    %c0_2 = arith.constant 0 : index
    %1 = vector.load %arg2[%c0_1, %c0_2] : memref<16x4xf32, #tpu.memory_space<vmem>>, vector<16x4xf32>
    tpu.vector_store %arg2[%c0_1, %c0_2], %0 {strides = array<i32>} : memref<16x4xf32, #tpu.memory_space<vmem>>, vector<16x4xf32>,
    %c0_3 = arith.constant 0 : index
    %c4 = arith.constant 4 : index
    %2 = vector.load %arg1[%c0_3, %c4] : memref<16x32xf32, #tpu.memory_space<vmem>>, vector<16x8xf32>
    %c0_4 = arith.constant 0 : index
    %c0_5 = arith.constant 0 : index
    %3 = vector.load %arg3[%c0_4, %c0_5] : memref<16x8xf32, #tpu.memory_space<vmem>>, vector<16x8xf32>
    tpu.vector_store %arg3[%c0_4, %c0_5], %2 {strides = array<i32>} : memref<16x8xf32, #tpu.memory_space<vmem>>, vector<16x8xf32>,
    %c0_6 = arith.constant 0 : index
    %c12 = arith.constant 12 : index
    %4 = vector.load %arg1[%c0_6, %c12] : memref<16x32xf32, #tpu.memory_space<vmem>>, vector<16x20xf32>
    %c0_7 = arith.constant 0 : index
    %c0_8 = arith.constant 0 : index
    %5 = vector.load %arg4[%c0_7, %c0_8] : memref<16x20xf32, #tpu.memory_space<vmem>>, vector<16x20xf32>
    tpu.vector_store %arg4[%c0_7, %c0_8], %4 {strides = array<i32>} : memref<16x20xf32, #tpu.memory_space<vmem>>, vector<16x20xf32>,
    return
  }
  func.func @transform_0(%arg0: i32) -> (i32, i32) {
    %c0_i32 = arith.constant 0 : i32
    %c0_i32_0 = arith.constant 0 : i32
    return %arg0, %c0_i32 : i32, i32
  }
  func.func @transform_1(%arg0: i32) -> (i32, i32) {
    %c0_i32 = arith.constant 0 : i32
    %c0_i32_0 = arith.constant 0 : i32
    return %arg0, %c0_i32 : i32, i32
  }
  func.func @transform_2(%arg0: i32) -> (i32, i32) {
    %c0_i32 = arith.constant 0 : i32
    %c0_i32_0 = arith.constant 0 : i32
    return %arg0, %c0_i32 : i32, i32
  }
  func.func @transform_3(%arg0: i32) -> (i32, i32) {
    %c0_i32 = arith.constant 0 : i32
    %c0_i32_0 = arith.constant 0 : i32
    return %arg0, %c0_i32 : i32, i32
  }
}

</mosaic_0001>

<bundles_post_ra>
// kernel: tpu_custom_call.1
= control target key start
LH: loop header
LB: loop body
LE: loop exit
PB: predicated region body
PF: predicated region fallthrough
CT: control target
= control target key end

     0   :  { %9 = vsyncpa [#allocation3], 0  ;;  %s204_s0 = inlined_call_operand.hbm [shape: f32[16,32], index: 0, kind: input, shape index: {}]   ;;  %s205_s1 = inlined_call_operand.vmem [shape: f32[16,4], index: 1, kind: output, shape index: {0}]   ;;  %s206_s2 = inlined_call_operand.vmem [shape: f32[16,8], index: 2, kind: output, shape index: {1}]   ;;  %s207_s3 = inlined_call_operand.hbm [shape: f32[16,20], index: 3, kind: output, shape index: {2}]  }
   0x1   :  { %10 = vsyncpa [#allocation4], 0  ;;  %s136_s12 = smov [#allocation2]   ;;  %s88_s16 = scalar_lea.hbm %s204_s0, 256 }
   0x2   :  { %s16_s13 = sshll.u32 %s136_s12, 4  ;;  %p89_p0 = scmp.ne.s32.totalorder %s204_s0, %s88_s16  ;;  %s17_s13 = int_to_ptr.vmem [resolvable:$true] %s16_s13 }
   0x3   :  { %p92_p1 = scmp.lt.u32.totalorder %s88_s16, %s204_s0 }
   0x5   :  { %p94_p2 = pnand %p92_p1, %p89_p0 }
   0x7   :  { %97 = shalt.err (!%p94_p2)
}
   0x8   :  { %s98_s21 = scalar_lea.vmem %s17_s13, 256  ;;  %p103_p4 = scmp.lt.s32.totalorder %s17_s13, %s17_s13 }
   0x9   :  { %p99_p3 = scmp.ne.s32.totalorder %s17_s13, %s98_s21  ;;  %p104_p5 = scmp.lt.s32.totalorder %s98_s21, %s98_s21 }
   0xb   :  { %p105_p6 = por %p104_p5, %p103_p4 }
   0xd   :  { %p106_p7 = pnand %p105_p6, %p99_p3 }
   0xf   :  { %109 = shalt.err (!%p106_p7)
}
  0x10   :  { %s137_s22 = smov 128   ;;  %s138_s23 = smov 8  }
  0x11   :  { %22 = dma.hbm_to_vmem [thread:$0]  %s204_s0, 256, %s17_s13, [#allocation3], %s137_s22, %s137_s22, %s138_s23  }
  0x12   :  { %132 = dma.done.wait [#allocation3], 256  }
  0x13   :  { %133 = vsyncadd [#allocation3], 4294967040  ;;  %vm28_vm0 = vcmask 31744   ;;  %v26_v0 = vld [vmem:[#allocation2] sm:$0xff]  ;;  %v27_v1 = vld [vmem:[#allocation2 + $0x8] sm:$0xff]  ;;  %s139_s30 = smov 116  }
  0x14   :  { %29 = vst.msk [vmem:[%s205_s1] sm:$0xff] %vm28_vm0, %v26_v0  ;;  %30 = vst.msk [vmem:[%s205_s1 + $0x8] sm:$0xff] %vm28_vm0, %v27_v1  ;;  %48 = vrot.lane.b32.xlu0 %v26_v0, %s139_s30  ;;  %s140_s4 = smov 124   ;;  %vm54_vm1 = vcmask 162816   ;;  %vm41_vm2 = vcmask 64512   ;;  %s141_s0 = smov [#allocation5]  }
  0x15   :  { %35 = vrot.lane.b32.xlu1 %v26_v0, %s140_s4  ;;  %s66_s5 = sshll.u32 %s141_s0, 4  ;;  %s67_s5 = int_to_ptr.vmem [resolvable:$true] %s66_s5 }
  0x16   :  { %s110_s9 = scalar_lea.vmem %s67_s5, 256  ;;  %p115_p9 = scmp.lt.s32.totalorder %s67_s5, %s67_s5 }
  0x17   :  { %p111_p8 = scmp.ne.s32.totalorder %s67_s5, %s110_s9  ;;  %p116_p10 = scmp.lt.s32.totalorder %s110_s9, %s110_s9 }
  0x18   :  { %50 = vrot.lane.b32.xlu0 %v27_v1, %s139_s30 }
  0x19   :  { %37 = vrot.lane.b32.xlu1 %v27_v1, %s140_s4  ;;  %p117_p11 = por %p116_p10, %p115_p9 }
  0x1b   :  { %p118_p12 = pnand %p117_p11, %p111_p8 }
  0x86   :  { %v49_v2 = vpop.permute.xlu0 %48 }
  0x87   :  { %v36_v3 = vpop.permute.xlu1 %35  ;;  %55 = vst.msk [vmem:[#allocation5] sm:$0xff] %vm54_vm1, %v49_v2 }
  0x88   :  { %42 = vst.msk [vmem:[%s206_s2] sm:$0xff] %vm41_vm2, %v36_v3 }
  0x8a   :  { %v51_v4 = vpop.permute.xlu0 %50 }
  0x8b   :  { %v38_v5 = vpop.permute.xlu1 %37  ;;  %56 = vst.msk [vmem:[#allocation5 + $0x8] sm:$0xff] %vm54_vm1, %v51_v4 }
  0x8c   :  { %43 = vst.msk [vmem:[%s206_s2 + $0x8] sm:$0xff] %vm41_vm2, %v38_v5 }
  0x8d   :  { %121 = shalt.err (!%p118_p12)
}
  0x8e   :  { %s122_s12 = scalar_lea.hbm %s207_s3, 256 }
  0x8f   :  { %p123_p13 = scmp.ne.s32.totalorder %s207_s3, %s122_s12  ;;  %p126_p0 = scmp.lt.u32.totalorder %s122_s12, %s207_s3 }
  0x91   :  { %p128_p1 = pnand %p126_p0, %p123_p13 }
  0x93   :  { %131 = shalt.err (!%p128_p1)
}
  0x94   :  { %72 = dma.vmem_to_hbm [thread:$0]  %s67_s5, 256, %s207_s3, [#allocation4], %s137_s22, %s137_s22, %s138_s23  }
  0x95   :  { %134 = dma.done.wait [#allocation4], 256  }
  0x96   :  { %135 = vsyncadd [#allocation4], 4294967040 }
  0x97   :  { %80 = vsyncpa [#allocation3], 1 }
  0x98   :  { %81 = vsyncpa [#allocation4], 1 }

</bundles_post_ra>
